<compile_context>
chip_gen: v7x
topology: tpu7x:2x2x1
jax: 0.10.0
libtpu: 0.0.40
codegen_flags: <defaults>
</compile_context>

<pallas_src>
import functools

import jax
import jax.numpy as jnp
from jax.experimental import pallas as pl
from jax.experimental.pallas import tpu as pltpu


def _round_up(x: int, m: int) -> int:
    return ((x + m - 1) // m) * m


def _esn_recurrence_kernel(uproj_ref, w_hbm_ref, h_out_ref,
                           w_vmem, h_carry, dma_sem):
    """Sequential reservoir update over one block of time steps.

    uproj_ref : (t_block, B_pad, N_pad) f32   precomputed W_in@u_t + bias
    w_hbm_ref : (N_pad, N_pad)                reservoir matrix (HBM, ANY space)
    h_out_ref : (t_block, B_pad, N_pad) f32   hidden states for this block
    w_vmem    : (N_pad, N_pad)                persistent resident copy of W^T
    h_carry   : (B_pad, N_pad) f32            persistent hidden-state carry
    dma_sem   : DMA semaphore for the one-time weight copy
    """
    @pl.when(pl.program_id(0) == 0)
    def _():
        # One-time: bring W^T into VMEM (stays resident & single-buffered for
        # the whole sequence) and zero the hidden-state carry (h_0 = 0).
        cp = pltpu.make_async_copy(w_hbm_ref, w_vmem, dma_sem)
        cp.start()
        cp.wait()
        h_carry[...] = jnp.zeros_like(h_carry)

    w_mat = w_vmem[...]                      # (N_pad, N_pad), weight dtype
    t_block = uproj_ref.shape[0]

    def step(s, carry):
        h_prev = h_carry[...]                                     # f32
        rec = jnp.dot(h_prev.astype(w_mat.dtype), w_mat,
                      preferred_element_type=jnp.float32)         # MXU, f32 acc
        h_new = jnp.tanh(uproj_ref[s] + rec)                      # f32 VPU/EUP
        h_carry[...] = h_new
        h_out_ref[s] = h_new
        return carry

    jax.lax.fori_loop(0, t_block, step, 0, unroll=True)


@functools.partial(jax.jit,
                   static_argnames=("washout", "t_block", "weight_dtype"))
def esn_forward(u, w, w_in, w_bias, w_out, *, washout=0, t_block=8,
                weight_dtype=jnp.bfloat16):
    """ESN forward pass.

    u      : (B, T, input_dim) f32
    w      : (hidden, hidden)      reservoir weights (PyTorch orientation)
    w_in   : (hidden, input_dim)   input weights
    w_bias : (hidden,)             bias
    w_out  : (hidden + 1, output)  readout ([bias_row; weights])
    returns: (B, T - washout, output)
    """
    B, T, D_in = u.shape
    N = w.shape[0]
    out_dim = w_out.shape[1]

    # ---- hoisted input projection: one big matmul, full MXU rate -----------
    w_in_t = jnp.transpose(w_in).astype(jnp.float32)              # (D_in, N)
    uproj = jnp.dot(u.reshape(B * T, D_in).astype(jnp.float32), w_in_t,
                    preferred_element_type=jnp.float32)
    uproj = uproj + w_bias.astype(jnp.float32)[None, :]
    uproj = uproj.reshape(B, T, N).transpose(1, 0, 2)             # (T, B, N)

    # ---- padding to TPU-friendly shapes -------------------------------------
    B_pad = _round_up(max(B, 1), 8)
    N_pad = _round_up(max(N, 1), 128)
    T_pad = _round_up(max(T, 1), t_block)

    uproj_p = jnp.zeros((T_pad, B_pad, N_pad), jnp.float32)
    uproj_p = uproj_p.at[:T, :B, :N].set(uproj)

    w_t = jnp.transpose(w).astype(weight_dtype)                   # h @ W^T
    w_t_p = jnp.zeros((N_pad, N_pad), weight_dtype).at[:N, :N].set(w_t)

    # ---- VMEM budget (resident W single-buffered + double-buffered I/O) ----
    itemsize_w = jnp.dtype(weight_dtype).itemsize
    block_bytes = t_block * B_pad * N_pad * 4
    vmem_needed = (N_pad * N_pad * itemsize_w      # resident W
                   + 2 * block_bytes               # uproj input (2 buffers)
                   + 2 * block_bytes               # hidden output (2 buffers)
                   + B_pad * N_pad * 4)            # hidden carry
    vmem_limit = int(min(64 * 1024 * 1024,
                         max(vmem_needed + (2 << 20), 16 << 20)))

    grid = (T_pad // t_block,)

    h_all = pl.pallas_call(
        _esn_recurrence_kernel,
        out_shape=jax.ShapeDtypeStruct((T_pad, B_pad, N_pad), jnp.float32),
        grid_spec=pltpu.PrefetchScalarGridSpec(
            num_scalar_prefetch=0,
            grid=grid,
            in_specs=[
                # per-block slab of the precomputed projection (pipelined)
                pl.BlockSpec((t_block, B_pad, N_pad), lambda t: (t, 0, 0)),
                # reservoir matrix stays in HBM; DMA'd once into VMEM scratch
                pl.BlockSpec(memory_space=pl.ANY),
            ],
            out_specs=pl.BlockSpec((t_block, B_pad, N_pad),
                                   lambda t: (t, 0, 0)),
            scratch_shapes=[
                pltpu.VMEM((N_pad, N_pad), weight_dtype),   # resident W^T
                pltpu.VMEM((B_pad, N_pad), jnp.float32),    # hidden carry
                pltpu.SemaphoreType.DMA(()),
            ],
        ),
        compiler_params=pltpu.CompilerParams(
            # time axis carries state -> must stay sequential ("arbitrary").
            # (For large batches, a leading 'parallel' batch-split axis would
            # let v7x's second TensorCore run half the batch independently.)
            dimension_semantics=("arbitrary",),
            vmem_limit_bytes=vmem_limit,
        ),
    )(uproj_p, w_t_p)

    # ---- un-pad, washout, lane-dense batched readout ------------------------
    h_states = h_all[:T, :B, :N].transpose(1, 0, 2)               # (B, T, N)
    h_kept = h_states[:, washout:, :]
    t_keep = T - washout
    # y = [1, h] @ w_out  ==  h @ w_out[1:] + w_out[0]   (no concatenation)
    y = jnp.dot(h_kept.reshape(B * t_keep, N),
                w_out[1:].astype(jnp.float32),
                preferred_element_type=jnp.float32)
    y = y + w_out[0].astype(jnp.float32)[None, :]
    return y.reshape(B, t_keep, out_dim)


def esn_reference(u, w, w_in, w_bias, w_out, *, washout=0,
                  weight_dtype=jnp.bfloat16):
    """Pure-JAX reference mirroring the kernel's precision choices."""
    B, T, D_in = u.shape
    N = w.shape[0]
    w_in_t = jnp.transpose(w_in).astype(jnp.float32)
    w_t = jnp.transpose(w).astype(weight_dtype)
    uproj = jnp.dot(u.reshape(B * T, D_in).astype(jnp.float32), w_in_t,
                    preferred_element_type=jnp.float32)
    uproj = (uproj + w_bias.astype(jnp.float32)[None, :]).reshape(B, T, N)

    def step(h, x_t):
        rec = jnp.dot(h.astype(weight_dtype), w_t,
                      preferred_element_type=jnp.float32)
        h_new = jnp.tanh(x_t + rec)
        return h_new, h_new

    h0 = jnp.zeros((B, N), jnp.float32)
    _, hs = jax.lax.scan(step, h0, jnp.swapaxes(uproj, 0, 1))     # (T, B, N)
    hs = jnp.swapaxes(hs, 0, 1)                                   # (B, T, N)
    hk = hs[:, washout:, :]
    t_keep = T - washout
    y = jnp.dot(hk.reshape(B * t_keep, N), w_out[1:].astype(jnp.float32),
                preferred_element_type=jnp.float32)
    y = y + w_out[0].astype(jnp.float32)[None, :]
    return y.reshape(B, t_keep, -1)


if __name__ == "__main__":
    key = jax.random.PRNGKey(0)
    batch, time_steps, input_dim, hidden_dim, output_dim = 2, 16, 4, 64, 3
    washout = 2

    k1, k2, k3, k4, k5 = jax.random.split(key, 5)
    u = jax.random.normal(k1, (batch, time_steps, input_dim), jnp.float32)
    # Reservoir scaled so its spectral radius is ~0.9 (circular-law estimate).
    w = (0.9 / jnp.sqrt(hidden_dim)) * jax.random.normal(
        k2, (hidden_dim, hidden_dim), jnp.float32)
    w_in = jax.random.uniform(k3, (hidden_dim, input_dim), jnp.float32,
                              -1.0, 1.0)
    w_bias = 0.1 * jax.random.uniform(k4, (hidden_dim,), jnp.float32,
                                      -1.0, 1.0)
    w_out = jax.random.normal(k5, (hidden_dim + 1, output_dim),
                              jnp.float32) / jnp.sqrt(hidden_dim)

    y = esn_forward(u, w, w_in, w_bias, w_out, washout=washout, t_block=8,
                    weight_dtype=jnp.bfloat16)
    y = jax.block_until_ready(y)

    y_ref = esn_reference(u, w, w_in, w_bias, w_out, washout=washout,
                          weight_dtype=jnp.bfloat16)
    assert y.shape == (batch, time_steps - washout, output_dim), y.shape
    max_err = float(jnp.max(jnp.abs(y - y_ref)))
    assert max_err < 5e-3, f"max abs error vs reference: {max_err}"
    print("KERNEL_OK")
</pallas_src>

<mosaic_0001>
module attributes {stable_mosaic.version = 11 : i64} {
  func.func @_esn_recurrence_kernel(%arg0: i32, %arg1: memref<8x8x128xf32, #tpu.memory_space<vmem>>, %arg2: memref<128x128xbf16, #tpu.memory_space<any>>, %arg3: memref<8x8x128xf32, #tpu.memory_space<vmem>>, %arg4: memref<128x128xbf16, #tpu.memory_space<vmem>>, %arg5: memref<8x128xf32, #tpu.memory_space<vmem>>, %arg6: memref<!tpu.dma_semaphore, #tpu.memory_space<semaphore_mem>>) attributes {dimension_semantics = [#tpu.dimension_semantics<arbitrary>], iteration_bounds = array<i64: 2>, scalar_prefetch = 0 : i64, scratch_operands = 3 : i64, tpu.core_type = #tpu.core_type<tc>, window_params = [{transform_indices = @transform_0, window_bounds = array<i64: 8, 8, 128>}, {}, {transform_indices = @transform_2, window_bounds = array<i64: 8, 8, 128>}]} {
    %c0_i32 = arith.constant 0 : i32
    %0 = arith.cmpi eq, %arg0, %c0_i32 : i32
    %1 = arith.extui %0 : i1 to i32
    %c0_i32_0 = arith.constant 0 : i32
    %2 = arith.cmpi ne, %1, %c0_i32_0 : i32
    scf.if %2 {
      tpu.enqueue_dma source(%arg2 : memref<128x128xbf16, #tpu.memory_space<any>>) target(%arg4 : memref<128x128xbf16, #tpu.memory_space<vmem>>) target_semaphore(%arg6 : memref<!tpu.dma_semaphore, #tpu.memory_space<semaphore_mem>>)
      tpu.wait_dma2 semaphore(%arg6 : memref<!tpu.dma_semaphore, #tpu.memory_space<semaphore_mem>>) src(%arg2 : memref<128x128xbf16, #tpu.memory_space<any>>) dst(%arg4 : memref<128x128xbf16, #tpu.memory_space<vmem>>)
      %cst_74 = arith.constant 0.000000e+00 : f32
      %108 = vector.broadcast %cst_74 : f32 to vector<8x128xf32>
      %c0_75 = arith.constant 0 : index
      %c0_76 = arith.constant 0 : index
      %109 = vector.load %arg5[%c0_75, %c0_76] : memref<8x128xf32, #tpu.memory_space<vmem>>, vector<8x128xf32>
      tpu.vector_store %arg5[%c0_75, %c0_76], %108 {strides = array<i32>} : memref<8x128xf32, #tpu.memory_space<vmem>>, vector<8x128xf32>,
    } else {
    }
    %c0 = arith.constant 0 : index
    %c0_1 = arith.constant 0 : index
    %3 = vector.load %arg4[%c0, %c0_1] : memref<128x128xbf16, #tpu.memory_space<vmem>>, vector<128x128xbf16>
    %c0_i32_2 = arith.constant 0 : i32
    %c0_3 = arith.constant 0 : index
    %c0_4 = arith.constant 0 : index
    %4 = vector.load %arg5[%c0_3, %c0_4] : memref<8x128xf32, #tpu.memory_space<vmem>>, vector<8x128xf32>
    %5 = arith.truncf %4 : vector<8x128xf32> to vector<8x128xbf16>
    %cst = arith.constant dense<0.000000e+00> : vector<8x128xf32>
    %6 = tpu.matmul %5, %3, %cst {dimension_numbers = #tpu.dot_dimension_numbers<[1], [0], [0], [1], [0, 0, 1, 1], [], []>} : vector<8x128xbf16>, vector<128x128xbf16>, vector<8x128xf32> -> vector<8x128xf32>
    %7 = arith.index_cast %c0_i32_2 : i32 to index
    %c0_5 = arith.constant 0 : index
    %c0_6 = arith.constant 0 : index
    %8 = vector.load %arg1[%7, %c0_5, %c0_6] : memref<8x8x128xf32, #tpu.memory_space<vmem>>, vector<1x8x128xf32>
    %9 = vector.shape_cast %8 : vector<1x8x128xf32> to vector<8x128xf32>
    %10 = arith.addf %9, %6 : vector<8x128xf32>
    %11 = math.tanh %10 : vector<8x128xf32>
    %c0_7 = arith.constant 0 : index
    %c0_8 = arith.constant 0 : index
    %12 = vector.load %arg5[%c0_7, %c0_8] : memref<8x128xf32, #tpu.memory_space<vmem>>, vector<8x128xf32>
    tpu.vector_store %arg5[%c0_7, %c0_8], %11 {strides = array<i32>} : memref<8x128xf32, #tpu.memory_space<vmem>>, vector<8x128xf32>,
    %13 = arith.index_cast %c0_i32_2 : i32 to index
    %c0_9 = arith.constant 0 : index
    %c0_10 = arith.constant 0 : index
    %14 = vector.load %arg3[%13, %c0_9, %c0_10] : memref<8x8x128xf32, #tpu.memory_space<vmem>>, vector<1x8x128xf32>
    %15 = vector.shape_cast %14 : vector<1x8x128xf32> to vector<8x128xf32>
    %16 = vector.shape_cast %11 : vector<8x128xf32> to vector<1x8x128xf32>
    tpu.vector_store %arg3[%13, %c0_9, %c0_10], %16 {strides = array<i32>} : memref<8x8x128xf32, #tpu.memory_space<vmem>>, vector<1x8x128xf32>,
    %c1_i32 = arith.constant 1 : i32
    %c0_11 = arith.constant 0 : index
    %c0_12 = arith.constant 0 : index
    %17 = vector.load %arg5[%c0_11, %c0_12] : memref<8x128xf32, #tpu.memory_space<vmem>>, vector<8x128xf32>
    %18 = arith.truncf %17 : vector<8x128xf32> to vector<8x128xbf16>
    %cst_13 = arith.constant dense<0.000000e+00> : vector<8x128xf32>
    %19 = tpu.matmul %18, %3, %cst_13 {dimension_numbers = #tpu.dot_dimension_numbers<[1], [0], [0], [1], [0, 0, 1, 1], [], []>} : vector<8x128xbf16>, vector<128x128xbf16>, vector<8x128xf32> -> vector<8x128xf32>
    %20 = arith.index_cast %c1_i32 : i32 to index
    %c0_14 = arith.constant 0 : index
    %c0_15 = arith.constant 0 : index
    %21 = vector.load %arg1[%20, %c0_14, %c0_15] : memref<8x8x128xf32, #tpu.memory_space<vmem>>, vector<1x8x128xf32>
    %22 = vector.shape_cast %21 : vector<1x8x128xf32> to vector<8x128xf32>
    %23 = arith.addf %22, %19 : vector<8x128xf32>
    %24 = math.tanh %23 : vector<8x128xf32>
    %c0_16 = arith.constant 0 : index
    %c0_17 = arith.constant 0 : index
    %25 = vector.load %arg5[%c0_16, %c0_17] : memref<8x128xf32, #tpu.memory_space<vmem>>, vector<8x128xf32>
    tpu.vector_store %arg5[%c0_16, %c0_17], %24 {strides = array<i32>} : memref<8x128xf32, #tpu.memory_space<vmem>>, vector<8x128xf32>,
    %26 = arith.index_cast %c1_i32 : i32 to index
    %c0_18 = arith.constant 0 : index
    %c0_19 = arith.constant 0 : index
    %27 = vector.load %arg3[%26, %c0_18, %c0_19] : memref<8x8x128xf32, #tpu.memory_space<vmem>>, vector<1x8x128xf32>
    %28 = vector.shape_cast %27 : vector<1x8x128xf32> to vector<8x128xf32>
    %29 = vector.shape_cast %24 : vector<8x128xf32> to vector<1x8x128xf32>
    tpu.vector_store %arg3[%26, %c0_18, %c0_19], %29 {strides = array<i32>} : memref<8x8x128xf32, #tpu.memory_space<vmem>>, vector<1x8x128xf32>,
    %c2_i32 = arith.constant 2 : i32
    %c0_20 = arith.constant 0 : index
    %c0_21 = arith.constant 0 : index
    %30 = vector.load %arg5[%c0_20, %c0_21] : memref<8x128xf32, #tpu.memory_space<vmem>>, vector<8x128xf32>
    %31 = arith.truncf %30 : vector<8x128xf32> to vector<8x128xbf16>
    %cst_22 = arith.constant dense<0.000000e+00> : vector<8x128xf32>
    %32 = tpu.matmul %31, %3, %cst_22 {dimension_numbers = #tpu.dot_dimension_numbers<[1], [0], [0], [1], [0, 0, 1, 1], [], []>} : vector<8x128xbf16>, vector<128x128xbf16>, vector<8x128xf32> -> vector<8x128xf32>
    %33 = arith.index_cast %c2_i32 : i32 to index
    %c0_23 = arith.constant 0 : index
    %c0_24 = arith.constant 0 : index
    %34 = vector.load %arg1[%33, %c0_23, %c0_24] : memref<8x8x128xf32, #tpu.memory_space<vmem>>, vector<1x8x128xf32>
    %35 = vector.shape_cast %34 : vector<1x8x128xf32> to vector<8x128xf32>
    %36 = arith.addf %35, %32 : vector<8x128xf32>
    %37 = math.tanh %36 : vector<8x128xf32>
    %c0_25 = arith.constant 0 : index
    %c0_26 = arith.constant 0 : index
    %38 = vector.load %arg5[%c0_25, %c0_26] : memref<8x128xf32, #tpu.memory_space<vmem>>, vector<8x128xf32>
    tpu.vector_store %arg5[%c0_25, %c0_26], %37 {strides = array<i32>} : memref<8x128xf32, #tpu.memory_space<vmem>>, vector<8x128xf32>,
    %39 = arith.index_cast %c2_i32 : i32 to index
    %c0_27 = arith.constant 0 : index
    %c0_28 = arith.constant 0 : index
    %40 = vector.load %arg3[%39, %c0_27, %c0_28] : memref<8x8x128xf32, #tpu.memory_space<vmem>>, vector<1x8x128xf32>
    %41 = vector.shape_cast %40 : vector<1x8x128xf32> to vector<8x128xf32>
    %42 = vector.shape_cast %37 : vector<8x128xf32> to vector<1x8x128xf32>
    tpu.vector_store %arg3[%39, %c0_27, %c0_28], %42 {strides = array<i32>} : memref<8x8x128xf32, #tpu.memory_space<vmem>>, vector<1x8x128xf32>,
    %c3_i32 = arith.constant 3 : i32
    %c0_29 = arith.constant 0 : index
    %c0_30 = arith.constant 0 : index
    %43 = vector.load %arg5[%c0_29, %c0_30] : memref<8x128xf32, #tpu.memory_space<vmem>>, vector<8x128xf32>
    %44 = arith.truncf %43 : vector<8x128xf32> to vector<8x128xbf16>
    %cst_31 = arith.constant dense<0.000000e+00> : vector<8x128xf32>
    %45 = tpu.matmul %44, %3, %cst_31 {dimension_numbers = #tpu.dot_dimension_numbers<[1], [0], [0], [1], [0, 0, 1, 1], [], []>} : vector<8x128xbf16>, vector<128x128xbf16>, vector<8x128xf32> -> vector<8x128xf32>
    %46 = arith.index_cast %c3_i32 : i32 to index
    %c0_32 = arith.constant 0 : index
    %c0_33 = arith.constant 0 : index
    %47 = vector.load %arg1[%46, %c0_32, %c0_33] : memref<8x8x128xf32, #tpu.memory_space<vmem>>, vector<1x8x128xf32>
    %48 = vector.shape_cast %47 : vector<1x8x128xf32> to vector<8x128xf32>
    %49 = arith.addf %48, %45 : vector<8x128xf32>
    %50 = math.tanh %49 : vector<8x128xf32>
    %c0_34 = arith.constant 0 : index
    %c0_35 = arith.constant 0 : index
    %51 = vector.load %arg5[%c0_34, %c0_35] : memref<8x128xf32, #tpu.memory_space<vmem>>, vector<8x128xf32>
    tpu.vector_store %arg5[%c0_34, %c0_35], %50 {strides = array<i32>} : memref<8x128xf32, #tpu.memory_space<vmem>>, vector<8x128xf32>,
    %52 = arith.index_cast %c3_i32 : i32 to index
    %c0_36 = arith.constant 0 : index
    %c0_37 = arith.constant 0 : index
    %53 = vector.load %arg3[%52, %c0_36, %c0_37] : memref<8x8x128xf32, #tpu.memory_space<vmem>>, vector<1x8x128xf32>
    %54 = vector.shape_cast %53 : vector<1x8x128xf32> to vector<8x128xf32>
    %55 = vector.shape_cast %50 : vector<8x128xf32> to vector<1x8x128xf32>
    tpu.vector_store %arg3[%52, %c0_36, %c0_37], %55 {strides = array<i32>} : memref<8x8x128xf32, #tpu.memory_space<vmem>>, vector<1x8x128xf32>,
    %c4_i32 = arith.constant 4 : i32
    %c0_38 = arith.constant 0 : index
    %c0_39 = arith.constant 0 : index
    %56 = vector.load %arg5[%c0_38, %c0_39] : memref<8x128xf32, #tpu.memory_space<vmem>>, vector<8x128xf32>
    %57 = arith.truncf %56 : vector<8x128xf32> to vector<8x128xbf16>
    %cst_40 = arith.constant dense<0.000000e+00> : vector<8x128xf32>
    %58 = tpu.matmul %57, %3, %cst_40 {dimension_numbers = #tpu.dot_dimension_numbers<[1], [0], [0], [1], [0, 0, 1, 1], [], []>} : vector<8x128xbf16>, vector<128x128xbf16>, vector<8x128xf32> -> vector<8x128xf32>
    %59 = arith.index_cast %c4_i32 : i32 to index
    %c0_41 = arith.constant 0 : index
    %c0_42 = arith.constant 0 : index
    %60 = vector.load %arg1[%59, %c0_41, %c0_42] : memref<8x8x128xf32, #tpu.memory_space<vmem>>, vector<1x8x128xf32>
    %61 = vector.shape_cast %60 : vector<1x8x128xf32> to vector<8x128xf32>
    %62 = arith.addf %61, %58 : vector<8x128xf32>
    %63 = math.tanh %62 : vector<8x128xf32>
    %c0_43 = arith.constant 0 : index
    %c0_44 = arith.constant 0 : index
    %64 = vector.load %arg5[%c0_43, %c0_44] : memref<8x128xf32, #tpu.memory_space<vmem>>, vector<8x128xf32>
    tpu.vector_store %arg5[%c0_43, %c0_44], %63 {strides = array<i32>} : memref<8x128xf32, #tpu.memory_space<vmem>>, vector<8x128xf32>,
    %65 = arith.index_cast %c4_i32 : i32 to index
    %c0_45 = arith.constant 0 : index
    %c0_46 = arith.constant 0 : index
    %66 = vector.load %arg3[%65, %c0_45, %c0_46] : memref<8x8x128xf32, #tpu.memory_space<vmem>>, vector<1x8x128xf32>
    %67 = vector.shape_cast %66 : vector<1x8x128xf32> to vector<8x128xf32>
    %68 = vector.shape_cast %63 : vector<8x128xf32> to vector<1x8x128xf32>
    tpu.vector_store %arg3[%65, %c0_45, %c0_46], %68 {strides = array<i32>} : memref<8x8x128xf32, #tpu.memory_space<vmem>>, vector<1x8x128xf32>,
    %c5_i32 = arith.constant 5 : i32
    %c0_47 = arith.constant 0 : index
    %c0_48 = arith.constant 0 : index
    %69 = vector.load %arg5[%c0_47, %c0_48] : memref<8x128xf32, #tpu.memory_space<vmem>>, vector<8x128xf32>
    %70 = arith.truncf %69 : vector<8x128xf32> to vector<8x128xbf16>
    %cst_49 = arith.constant dense<0.000000e+00> : vector<8x128xf32>
    %71 = tpu.matmul %70, %3, %cst_49 {dimension_numbers = #tpu.dot_dimension_numbers<[1], [0], [0], [1], [0, 0, 1, 1], [], []>} : vector<8x128xbf16>, vector<128x128xbf16>, vector<8x128xf32> -> vector<8x128xf32>
    %72 = arith.index_cast %c5_i32 : i32 to index
    %c0_50 = arith.constant 0 : index
    %c0_51 = arith.constant 0 : index
    %73 = vector.load %arg1[%72, %c0_50, %c0_51] : memref<8x8x128xf32, #tpu.memory_space<vmem>>, vector<1x8x128xf32>
    %74 = vector.shape_cast %73 : vector<1x8x128xf32> to vector<8x128xf32>
    %75 = arith.addf %74, %71 : vector<8x128xf32>
    %76 = math.tanh %75 : vector<8x128xf32>
    %c0_52 = arith.constant 0 : index
    %c0_53 = arith.constant 0 : index
    %77 = vector.load %arg5[%c0_52, %c0_53] : memref<8x128xf32, #tpu.memory_space<vmem>>, vector<8x128xf32>
    tpu.vector_store %arg5[%c0_52, %c0_53], %76 {strides = array<i32>} : memref<8x128xf32, #tpu.memory_space<vmem>>, vector<8x128xf32>,
    %78 = arith.index_cast %c5_i32 : i32 to index
    %c0_54 = arith.constant 0 : index
    %c0_55 = arith.constant 0 : index
    %79 = vector.load %arg3[%78, %c0_54, %c0_55] : memref<8x8x128xf32, #tpu.memory_space<vmem>>, vector<1x8x128xf32>
    %80 = vector.shape_cast %79 : vector<1x8x128xf32> to vector<8x128xf32>
    %81 = vector.shape_cast %76 : vector<8x128xf32> to vector<1x8x128xf32>
    tpu.vector_store %arg3[%78, %c0_54, %c0_55], %81 {strides = array<i32>} : memref<8x8x128xf32, #tpu.memory_space<vmem>>, vector<1x8x128xf32>,
    %c6_i32 = arith.constant 6 : i32
    %c0_56 = arith.constant 0 : index
    %c0_57 = arith.constant 0 : index
    %82 = vector.load %arg5[%c0_56, %c0_57] : memref<8x128xf32, #tpu.memory_space<vmem>>, vector<8x128xf32>
    %83 = arith.truncf %82 : vector<8x128xf32> to vector<8x128xbf16>
    %cst_58 = arith.constant dense<0.000000e+00> : vector<8x128xf32>
    %84 = tpu.matmul %83, %3, %cst_58 {dimension_numbers = #tpu.dot_dimension_numbers<[1], [0], [0], [1], [0, 0, 1, 1], [], []>} : vector<8x128xbf16>, vector<128x128xbf16>, vector<8x128xf32> -> vector<8x128xf32>
    %85 = arith.index_cast %c6_i32 : i32 to index
    %c0_59 = arith.constant 0 : index
    %c0_60 = arith.constant 0 : index
    %86 = vector.load %arg1[%85, %c0_59, %c0_60] : memref<8x8x128xf32, #tpu.memory_space<vmem>>, vector<1x8x128xf32>
    %87 = vector.shape_cast %86 : vector<1x8x128xf32> to vector<8x128xf32>
    %88 = arith.addf %87, %84 : vector<8x128xf32>
    %89 = math.tanh %88 : vector<8x128xf32>
    %c0_61 = arith.constant 0 : index
    %c0_62 = arith.constant 0 : index
    %90 = vector.load %arg5[%c0_61, %c0_62] : memref<8x128xf32, #tpu.memory_space<vmem>>, vector<8x128xf32>
    tpu.vector_store %arg5[%c0_61, %c0_62], %89 {strides = array<i32>} : memref<8x128xf32, #tpu.memory_space<vmem>>, vector<8x128xf32>,
    %91 = arith.index_cast %c6_i32 : i32 to index
    %c0_63 = arith.constant 0 : index
    %c0_64 = arith.constant 0 : index
    %92 = vector.load %arg3[%91, %c0_63, %c0_64] : memref<8x8x128xf32, #tpu.memory_space<vmem>>, vector<1x8x128xf32>
    %93 = vector.shape_cast %92 : vector<1x8x128xf32> to vector<8x128xf32>
    %94 = vector.shape_cast %89 : vector<8x128xf32> to vector<1x8x128xf32>
    tpu.vector_store %arg3[%91, %c0_63, %c0_64], %94 {strides = array<i32>} : memref<8x8x128xf32, #tpu.memory_space<vmem>>, vector<1x8x128xf32>,
    %c7_i32 = arith.constant 7 : i32
    %c0_65 = arith.constant 0 : index
    %c0_66 = arith.constant 0 : index
    %95 = vector.load %arg5[%c0_65, %c0_66] : memref<8x128xf32, #tpu.memory_space<vmem>>, vector<8x128xf32>
    %96 = arith.truncf %95 : vector<8x128xf32> to vector<8x128xbf16>
    %cst_67 = arith.constant dense<0.000000e+00> : vector<8x128xf32>
    %97 = tpu.matmul %96, %3, %cst_67 {dimension_numbers = #tpu.dot_dimension_numbers<[1], [0], [0], [1], [0, 0, 1, 1], [], []>} : vector<8x128xbf16>, vector<128x128xbf16>, vector<8x128xf32> -> vector<8x128xf32>
    %98 = arith.index_cast %c7_i32 : i32 to index
    %c0_68 = arith.constant 0 : index
    %c0_69 = arith.constant 0 : index
    %99 = vector.load %arg1[%98, %c0_68, %c0_69] : memref<8x8x128xf32, #tpu.memory_space<vmem>>, vector<1x8x128xf32>
    %100 = vector.shape_cast %99 : vector<1x8x128xf32> to vector<8x128xf32>
    %101 = arith.addf %100, %97 : vector<8x128xf32>
    %102 = math.tanh %101 : vector<8x128xf32>
    %c0_70 = arith.constant 0 : index
    %c0_71 = arith.constant 0 : index
    %103 = vector.load %arg5[%c0_70, %c0_71] : memref<8x128xf32, #tpu.memory_space<vmem>>, vector<8x128xf32>
    tpu.vector_store %arg5[%c0_70, %c0_71], %102 {strides = array<i32>} : memref<8x128xf32, #tpu.memory_space<vmem>>, vector<8x128xf32>,
    %104 = arith.index_cast %c7_i32 : i32 to index
    %c0_72 = arith.constant 0 : index
    %c0_73 = arith.constant 0 : index
    %105 = vector.load %arg3[%104, %c0_72, %c0_73] : memref<8x8x128xf32, #tpu.memory_space<vmem>>, vector<1x8x128xf32>
    %106 = vector.shape_cast %105 : vector<1x8x128xf32> to vector<8x128xf32>
    %107 = vector.shape_cast %102 : vector<8x128xf32> to vector<1x8x128xf32>
    tpu.vector_store %arg3[%104, %c0_72, %c0_73], %107 {strides = array<i32>} : memref<8x8x128xf32, #tpu.memory_space<vmem>>, vector<1x8x128xf32>,
    %c8_i32 = arith.constant 8 : i32
    return
  }
  func.func @transform_0(%arg0: i32) -> (i32, i32, i32) {
    %c0_i32 = arith.constant 0 : i32
    %c0_i32_0 = arith.constant 0 : i32
    %c0_i32_1 = arith.constant 0 : i32
    return %arg0, %c0_i32, %c0_i32_0 : i32, i32, i32
  }
  func.func @transform_2(%arg0: i32) -> (i32, i32, i32) {
    %c0_i32 = arith.constant 0 : i32
    %c0_i32_0 = arith.constant 0 : i32
    %c0_i32_1 = arith.constant 0 : i32
    return %arg0, %c0_i32, %c0_i32_0 : i32, i32, i32
  }
}

</mosaic_0001>

<bundles_post_ra>
// kernel: esn_forward.1
= control target key start
LH: loop header
LB: loop body
LE: loop exit
PB: predicated region body
PF: predicated region fallthrough
CT: control target
= control target key end

     0   :  { %s969_s9 = smov 0   ;;  %s1190_s0 = inlined_call_operand.vmem [shape: f32[16,8,128], index: 0, kind: input, shape index: {}]   ;;  %s1191_s1 = inlined_call_operand.vmem [shape: bf16[128,128], index: 1, kind: input, shape index: {}]   ;;  %s1192_s2 = inlined_call_operand.vmem [shape: f32[16,8,128], index: 2, kind: output, shape index: {}]  }
   0x1 LB: > { %s655_s10 = sadd.s32 4294967295, %s949_s9   ;;  %p659_p0 = scmp.ge.s32.totalorder %s949_s9, 1  ;;  %s949_s9 = sphi %s969_s9, %s12_s9  }
   0x2   : > { %p89_p1 = scmp.lt.s32.totalorder %s949_s9, 3 }
   0x4   : > { %p90_p2 = pnand %p659_p0, %p89_p1 }
   0x5   : > { %s660_s11 = sshll.u32 (!%p90_p2), %s655_s10, 3  ;;  %p664_p4 = scmp.ne.s32.totalorder (!%p90_p2), %s655_s10, 0 }
   0x6   : > { %93 = sbr.rel (%p90_p2) target bundleno = 1873 (0x751), region = 24  ;;  %p110_p3 = scmp.lt.s32.totalorder (!%p90_p2), %s660_s11, 15 }
   0xd   : > { %s1194_s11 = smov (!%p110_p3, %s660_s11), 15  ;;  %125 = sbr.rel (%p664_p4) target bundleno = 24 (0x18), region = 28 }
   0xe   : > { %s661_s12 = sshll.u32 %s1194_s11, 3  ;;  %v158_v0 = vld [vmem:[%s1191_s1] sm:$0xff] (!%p664_p4)  ;;  %v160_v1 = vld [vmem:[%s1191_s1 + $0x8] sm:$0xff] (!%p664_p4)  ;;  %v162_v2 = vld [vmem:[%s1191_s1 + $0x10] sm:$0xff] (!%p664_p4) }
   0xf   : > { %s980_s15 = scalar_lea.vmem %s1190_s0, %s661_s12  ;;  %s985_s18 = scalar_lea.vmem %s1192_s2, %s661_s12  ;;  %159 = vst [vmem:[#allocation2] sm:$0xff] (!%p664_p4), %v158_v0  ;;  %161 = vst [vmem:[#allocation2 + $0x8] sm:$0xff] (!%p664_p4), %v160_v1  ;;  %v164_v3 = vld [vmem:[%s1191_s1 + $0x18] sm:$0xff] (!%p664_p4)  ;;  %v166_v4 = vld [vmem:[%s1191_s1 + $0x20] sm:$0xff] (!%p664_p4) }
  0x10   : > { %163 = vst [vmem:[#allocation2 + $0x10] sm:$0xff] (!%p664_p4), %v162_v2  ;;  %v168_v5 = vld [vmem:[%s1191_s1 + $0x28] sm:$0xff] (!%p664_p4)  ;;  %165 = vst [vmem:[#allocation2 + $0x18] sm:$0xff] (!%p664_p4), %v164_v3  ;;  %v170_v6 = vld [vmem:[%s1191_s1 + $0x30] sm:$0xff] (!%p664_p4) }
  0x11   : > { %167 = vst [vmem:[#allocation2 + $0x20] sm:$0xff] (!%p664_p4), %v166_v4  ;;  %169 = vst [vmem:[#allocation2 + $0x28] sm:$0xff] (!%p664_p4), %v168_v5  ;;  %v172_v7 = vld [vmem:[%s1191_s1 + $0x38] sm:$0xff] (!%p664_p4) }
  0x12   : > { %171 = vst [vmem:[#allocation2 + $0x30] sm:$0xff] (!%p664_p4), %v170_v6  ;;  %173 = vst [vmem:[#allocation2 + $0x38] sm:$0xff] (!%p664_p4), %v172_v7 }
  0x14   : > { %181 = vsyncadd [#allocation4], 1024 }
  0x15   : > { %945 = dma.done.wait [#allocation4], 1024 }
  0x16   : > { %946 = vsyncadd [#allocation4], 4294966272  ;;  %v951_v8 = vmov 0.0  }
  0x17   : > { %186 = vst [vmem:[#allocation3] sm:$0xff] %v951_v8 }
  0x18 PF: > { %v952_v10 = vmov 0.0   ;;  %vm953_vm0 = vmmov 0   ;;  %v237_v20 = vld [vmem:[%s980_s15] sm:$0xff]  ;;  %v665_v28 = vld [vmem:[%s980_s15 + $0x8] sm:$0xff]  ;;  %v667_v36 = vld [vmem:[%s980_s15 + $0x10] sm:$0xff] }
  0x19   : > { %754 = vmatprep.subr.bf16.mxu0 %v952_v10  ;;  %770 = vmatprep.mubr.msk.bf16.mxu0 %vm953_vm0, %v952_v10  ;;  %v669_v44 = vld [vmem:[%s980_s15 + $0x18] sm:$0xff]  ;;  %v671_v52 = vld [vmem:[%s980_s15 + $0x20] sm:$0xff]  ;;  %v673_v60 = vld [vmem:[%s980_s15 + $0x28] sm:$0xff] }
  0x1a   : > { %v1011_v9 = vld [vmem:[#allocation2] sm:$0xff]  ;;  %774 = vmatprep.subr.bf16.mxu1 %v952_v10  ;;  %v1019_v11 = vld [vmem:[#allocation2 + $0x8] sm:$0xff]  ;;  %790 = vmatprep.mubr.msk.bf16.mxu1 %vm953_vm0, %v952_v10  ;;  %v675_v4 = vld [vmem:[%s980_s15 + $0x30] sm:$0xff] }
  0x1b   : > { %755 = vmatpush3.bf16.msra.mxu0 %v1011_v9  ;;  %775 = vmatpush3.bf16.msra.mxu1 %v1011_v9  ;;  %v1027_v12 = vld [vmem:[#allocation2 + $0x10] sm:$0xff]  ;;  %v1033_v13 = vld [vmem:[#allocation2 + $0x18] sm:$0xff] }
  0x1c   : > { %756 = vmatprep.subr.bf16.mxu0 %v952_v10  ;;  %776 = vmatprep.subr.bf16.mxu1 %v952_v10  ;;  %v1039_v14 = vld [vmem:[#allocation2 + $0x20] sm:$0xff]  ;;  %v1045_v15 = vld [vmem:[#allocation2 + $0x28] sm:$0xff] }
  0x1d   : > { %v1051_v16 = vld [vmem:[#allocation2 + $0x30] sm:$0xff]  ;;  %v1057_v18 = vld [vmem:[#allocation2 + $0x38] sm:$0xff] }
  0x1e   : > { %v195_v17 = vld [vmem:[#allocation3] sm:$0xff] }
  0x1f   : > { %757 = vmatpush3.bf16.msra.mxu0 %v1019_v11  ;;  %777 = vmatpush3.bf16.msra.mxu1 %v1019_v11  ;;  %v196_v19 = vpack.c.bf16 %v195_v17, %v195_v17 }
  0x20   : > { %758 = vmatprep.subr.bf16.mxu0 %v952_v10  ;;  %778 = vmatprep.subr.bf16.mxu1 %v952_v10 }
  0x23   : > { %759 = vmatpush3.bf16.msra.mxu0 %v1027_v12  ;;  %779 = vmatpush3.bf16.msra.mxu1 %v1027_v12 }
  0x24   : > { %760 = vmatprep.subr.bf16.mxu0 %v952_v10  ;;  %780 = vmatprep.subr.bf16.mxu1 %v952_v10 }
  0x27   : > { %761 = vmatpush3.bf16.msra.mxu0 %v1033_v13  ;;  %781 = vmatpush3.bf16.msra.mxu1 %v1033_v13 }
  0x28   : > { %762 = vmatprep.subr.bf16.mxu0 %v952_v10  ;;  %782 = vmatprep.subr.bf16.mxu1 %v952_v10 }
  0x2b   : > { %763 = vmatpush3.bf16.msra.mxu0 %v1039_v14  ;;  %783 = vmatpush3.bf16.msra.mxu1 %v1039_v14 }
  0x2c   : > { %764 = vmatprep.subr.bf16.mxu0 %v952_v10  ;;  %784 = vmatprep.subr.bf16.mxu1 %v952_v10 }
  0x2f   : > { %765 = vmatpush3.bf16.msra.mxu0 %v1045_v15  ;;  %785 = vmatpush3.bf16.msra.mxu1 %v1045_v15 }
  0x30   : > { %766 = vmatprep.subr.bf16.mxu0 %v952_v10  ;;  %786 = vmatprep.subr.bf16.mxu1 %v952_v10 }
  0x33   : > { %767 = vmatpush3.bf16.msra.mxu0 %v1051_v16  ;;  %787 = vmatpush3.bf16.msra.mxu1 %v1051_v16 }
  0x34   : > { %768 = vmatprep.subr.bf16.mxu0 %v952_v10  ;;  %788 = vmatprep.subr.bf16.mxu1 %v952_v10 }
  0x37   : > { %769 = vmatpush3.bf16.msra.mxu0 %v1057_v18  ;;  %789 = vmatpush3.bf16.msra.mxu1 %v1057_v18 }
  0x38   : > { %794 = vmatprep.subr.bf16.mxu0 %v952_v10  ;;  %814 = vmatprep.subr.bf16.mxu1 %v952_v10 }
  0x3a   : > { %771 = vmatmul.mubr.bf16.vlgmr.msra.gmra.mrb[0].mxu0 %v196_v19 }
  0x3b   : > { %795 = vmatpush3.bf16.msra.mxu0 %v1011_v9  ;;  %810 = vmatprep.mubr.msk.bf16.mxu0 %vm953_vm0, %v952_v10 }
  0x3c   : > { %796 = vmatprep.subr.bf16.mxu0 %v952_v10 }
  0x3f   : > { %797 = vmatpush3.bf16.msra.mxu0 %v1019_v11 }
  0x40   : > { %798 = vmatprep.subr.bf16.mxu0 %v952_v10 }
  0x43   : > { %799 = vmatpush3.bf16.msra.mxu0 %v1027_v12 }
  0x44   : > { %800 = vmatprep.subr.bf16.mxu0 %v952_v10 }
  0x47   : > { %801 = vmatpush3.bf16.msra.mxu0 %v1033_v13 }
  0x48   : > { %802 = vmatprep.subr.bf16.mxu0 %v952_v10 }
  0x4b   : > { %803 = vmatpush3.bf16.msra.mxu0 %v1039_v14 }
  0x4c   : > { %804 = vmatprep.subr.bf16.mxu0 %v952_v10 }
  0x4f   : > { %805 = vmatpush3.bf16.msra.mxu0 %v1045_v15 }
  0x50   : > { %806 = vmatprep.subr.bf16.mxu0 %v952_v10 }
  0x53   : > { %807 = vmatpush3.bf16.msra.mxu0 %v1051_v16 }
  0x54   : > { %808 = vmatprep.subr.bf16.mxu0 %v952_v10 }
  0x57   : > { %809 = vmatpush3.bf16.msra.mxu0 %v1057_v18 }
  0x58   : > { %834 = vmatprep.subr.bf16.mxu0 %v952_v10 }
 0x10d   : > { %v231_v21 = vpop.f32.mrb[0].mxu0 }
 0x10e   : > { %v238_v22 = vadd.f32 %v237_v20, %v231_v21  ;;  %v772_v23 = vpop.f32.mrb[1].mxu0 }
 0x10f   : > { %v234_v24 = vpop.f32.mrb[2].mxu0 }
 0x110   : > { %925 = vtanh.f32 %v238_v22  ;;  %v773_v25 = vpop.f32.mrb[3].mxu0 }
 0x11a   : > { %v926_v26 = vpop.eup %925 }
 0x11b   : > { %241 = vst [vmem:[%s985_s18] sm:$0xff] %v926_v26  ;;  %v243_v27 = vpack.c.bf16 %v926_v26, %v926_v26 }
 0x11d   : > { %791 = vmatmul.mubr.bf16.vlgmr.msra.gmra.mrb[0].mxu1 %v243_v27 }
 0x11e   : > { %815 = vmatpush3.bf16.msra.mxu1 %v1011_v9  ;;  %830 = vmatprep.mubr.msk.bf16.mxu1 %vm953_vm0, %v952_v10 }
 0x11f   : > { %816 = vmatprep.subr.bf16.mxu1 %v952_v10 }
 0x122   : > { %817 = vmatpush3.bf16.msra.mxu1 %v1019_v11 }
 0x123   : > { %818 = vmatprep.subr.bf16.mxu1 %v952_v10 }
 0x126   : > { %819 = vmatpush3.bf16.msra.mxu1 %v1027_v12 }
 0x127   : > { %820 = vmatprep.subr.bf16.mxu1 %v952_v10 }
 0x12a   : > { %821 = vmatpush3.bf16.msra.mxu1 %v1033_v13 }
 0x12b   : > { %822 = vmatprep.subr.bf16.mxu1 %v952_v10 }
 0x12e   : > { %823 = vmatpush3.bf16.msra.mxu1 %v1039_v14 }
 0x12f   : > { %824 = vmatprep.subr.bf16.mxu1 %v952_v10 }
 0x132   : > { %825 = vmatpush3.bf16.msra.mxu1 %v1045_v15 }
 0x133   : > { %826 = vmatprep.subr.bf16.mxu1 %v952_v10 }
 0x136   : > { %827 = vmatpush3.bf16.msra.mxu1 %v1051_v16 }
 0x137   : > { %828 = vmatprep.subr.bf16.mxu1 %v952_v10 }
 0x13a   : > { %829 = vmatpush3.bf16.msra.mxu1 %v1057_v18 }
 0x13b   : > { %854 = vmatprep.subr.bf16.mxu1 %v952_v10 }
 0x1f0   : > { %v278_v29 = vpop.f32.mrb[0].mxu1 }
 0x1f1   : > { %v286_v30 = vadd.f32 %v665_v28, %v278_v29  ;;  %v792_v31 = vpop.f32.mrb[1].mxu1 }
 0x1f2   : > { %v281_v32 = vpop.f32.mrb[2].mxu1 }
 0x1f3   : > { %927 = vtanh.f32 %v286_v30  ;;  %v793_v33 = vpop.f32.mrb[3].mxu1 }
 0x1fd   : > { %v928_v34 = vpop.eup %927 }
 0x1fe   : > { %666 = vst [vmem:[%s985_s18 + $0x8] sm:$0xff] %v928_v34  ;;  %v292_v35 = vpack.c.bf16 %v928_v34, %v928_v34 }
 0x200   : > { %811 = vmatmul.mubr.bf16.vlgmr.msra.gmra.mrb[4].mxu0 %v292_v35 }
 0x201   : > { %835 = vmatpush3.bf16.msra.mxu0 %v1011_v9  ;;  %850 = vmatprep.mubr.msk.bf16.mxu0 %vm953_vm0, %v952_v10 }
 0x202   : > { %836 = vmatprep.subr.bf16.mxu0 %v952_v10 }
 0x205   : > { %837 = vmatpush3.bf16.msra.mxu0 %v1019_v11 }
 0x206   : > { %838 = vmatprep.subr.bf16.mxu0 %v952_v10 }
 0x209   : > { %839 = vmatpush3.bf16.msra.mxu0 %v1027_v12 }
 0x20a   : > { %840 = vmatprep.subr.bf16.mxu0 %v952_v10 }
 0x20d   : > { %841 = vmatpush3.bf16.msra.mxu0 %v1033_v13 }
 0x20e   : > { %842 = vmatprep.subr.bf16.mxu0 %v952_v10 }
 0x211   : > { %843 = vmatpush3.bf16.msra.mxu0 %v1039_v14 }
 0x212   : > { %844 = vmatprep.subr.bf16.mxu0 %v952_v10 }
 0x215   : > { %845 = vmatpush3.bf16.msra.mxu0 %v1045_v15 }
 0x216   : > { %846 = vmatprep.subr.bf16.mxu0 %v952_v10 }
 0x219   : > { %847 = vmatpush3.bf16.msra.mxu0 %v1051_v16 }
 0x21a   : > { %848 = vmatprep.subr.bf16.mxu0 %v952_v10 }
 0x21d   : > { %849 = vmatpush3.bf16.msra.mxu0 %v1057_v18 }
 0x21e   : > { %874 = vmatprep.subr.bf16.mxu0 %v952_v10 }
 0x2d3   : > { %v327_v37 = vpop.f32.mrb[4].mxu0 }
 0x2d4   : > { %v335_v38 = vadd.f32 %v667_v36, %v327_v37  ;;  %v812_v39 = vpop.f32.mrb[5].mxu0 }
 0x2d5   : > { %v330_v40 = vpop.f32.mrb[6].mxu0 }
 0x2d6   : > { %929 = vtanh.f32 %v335_v38  ;;  %v813_v41 = vpop.f32.mrb[7].mxu0 }
 0x2e0   : > { %v930_v42 = vpop.eup %929 }
 0x2e1   : > { %668 = vst [vmem:[%s985_s18 + $0x10] sm:$0xff] %v930_v42  ;;  %v341_v43 = vpack.c.bf16 %v930_v42, %v930_v42 }
 0x2e3   : > { %831 = vmatmul.mubr.bf16.vlgmr.msra.gmra.mrb[4].mxu1 %v341_v43 }
 0x2e4   : > { %855 = vmatpush3.bf16.msra.mxu1 %v1011_v9  ;;  %870 = vmatprep.mubr.msk.bf16.mxu1 %vm953_vm0, %v952_v10 }
 0x2e5   : > { %856 = vmatprep.subr.bf16.mxu1 %v952_v10 }
 0x2e8   : > { %857 = vmatpush3.bf16.msra.mxu1 %v1019_v11 }
 0x2e9   : > { %858 = vmatprep.subr.bf16.mxu1 %v952_v10 }
 0x2ec   : > { %859 = vmatpush3.bf16.msra.mxu1 %v1027_v12 }
 0x2ed   : > { %860 = vmatprep.subr.bf16.mxu1 %v952_v10 }
 0x2f0   : > { %861 = vmatpush3.bf16.msra.mxu1 %v1033_v13 }
 0x2f1   : > { %862 = vmatprep.subr.bf16.mxu1 %v952_v10 }
 0x2f4   : > { %863 = vmatpush3.bf16.msra.mxu1 %v1039_v14 }
 0x2f5   : > { %864 = vmatprep.subr.bf16.mxu1 %v952_v10 }
 0x2f8   : > { %865 = vmatpush3.bf16.msra.mxu1 %v1045_v15 }
 0x2f9   : > { %866 = vmatprep.subr.bf16.mxu1 %v952_v10 }
 0x2fc   : > { %867 = vmatpush3.bf16.msra.mxu1 %v1051_v16 }
 0x2fd   : > { %868 = vmatprep.subr.bf16.mxu1 %v952_v10 }
 0x300   : > { %869 = vmatpush3.bf16.msra.mxu1 %v1057_v18 }
 0x301   : > { %894 = vmatprep.subr.bf16.mxu1 %v952_v10 }
 0x3b6   : > { %v376_v45 = vpop.f32.mrb[4].mxu1 }
 0x3b7   : > { %v384_v46 = vadd.f32 %v669_v44, %v376_v45  ;;  %v832_v47 = vpop.f32.mrb[5].mxu1 }
 0x3b8   : > { %v379_v48 = vpop.f32.mrb[6].mxu1 }
 0x3b9   : > { %931 = vtanh.f32 %v384_v46  ;;  %v833_v49 = vpop.f32.mrb[7].mxu1 }
 0x3c3   : > { %v932_v50 = vpop.eup %931 }
 0x3c4   : > { %670 = vst [vmem:[%s985_s18 + $0x18] sm:$0xff] %v932_v50  ;;  %v390_v51 = vpack.c.bf16 %v932_v50, %v932_v50 }
 0x3c6   : > { %851 = vmatmul.mubr.bf16.vlgmr.msra.gmra.mrb[8].mxu0 %v390_v51 }
 0x3c7   : > { %875 = vmatpush3.bf16.msra.mxu0 %v1011_v9  ;;  %890 = vmatprep.mubr.msk.bf16.mxu0 %vm953_vm0, %v952_v10 }
 0x3c8   : > { %876 = vmatprep.subr.bf16.mxu0 %v952_v10 }
 0x3cb   : > { %877 = vmatpush3.bf16.msra.mxu0 %v1019_v11 }
 0x3cc   : > { %878 = vmatprep.subr.bf16.mxu0 %v952_v10 }
 0x3cf   : > { %879 = vmatpush3.bf16.msra.mxu0 %v1027_v12 }
 0x3d0   : > { %880 = vmatprep.subr.bf16.mxu0 %v952_v10 }
 0x3d3   : > { %881 = vmatpush3.bf16.msra.mxu0 %v1033_v13 }
 0x3d4   : > { %882 = vmatprep.subr.bf16.mxu0 %v952_v10 }
 0x3d7   : > { %883 = vmatpush3.bf16.msra.mxu0 %v1039_v14 }
 0x3d8   : > { %884 = vmatprep.subr.bf16.mxu0 %v952_v10 }
 0x3db   : > { %885 = vmatpush3.bf16.msra.mxu0 %v1045_v15 }
 0x3dc   : > { %886 = vmatprep.subr.bf16.mxu0 %v952_v10 }
 0x3df   : > { %887 = vmatpush3.bf16.msra.mxu0 %v1051_v16 }
 0x3e0   : > { %888 = vmatprep.subr.bf16.mxu0 %v952_v10 }
 0x3e3   : > { %889 = vmatpush3.bf16.msra.mxu0 %v1057_v18 }
 0x499   : > { %v425_v53 = vpop.f32.mrb[8].mxu0 }
 0x49a   : > { %v433_v54 = vadd.f32 %v671_v52, %v425_v53  ;;  %v852_v55 = vpop.f32.mrb[9].mxu0 }
 0x49b   : > { %v428_v56 = vpop.f32.mrb[10].mxu0 }
 0x49c   : > { %933 = vtanh.f32 %v433_v54  ;;  %v853_v57 = vpop.f32.mrb[11].mxu0 }
 0x4a6   : > { %v934_v58 = vpop.eup %933 }
 0x4a7   : > { %672 = vst [vmem:[%s985_s18 + $0x20] sm:$0xff] %v934_v58  ;;  %v439_v59 = vpack.c.bf16 %v934_v58, %v934_v58 }
 0x4a9   : > { %871 = vmatmul.mubr.bf16.vlgmr.msra.gmra.mrb[8].mxu1 %v439_v59 }
 0x4aa   : > { %895 = vmatpush3.bf16.msra.mxu1 %v1011_v9  ;;  %910 = vmatprep.mubr.msk.bf16.mxu1 %vm953_vm0, %v952_v10 }
 0x4ab   : > { %896 = vmatprep.subr.bf16.mxu1 %v952_v10 }
 0x4ae   : > { %897 = vmatpush3.bf16.msra.mxu1 %v1019_v11 }
 0x4af   : > { %898 = vmatprep.subr.bf16.mxu1 %v952_v10 }
 0x4b2   : > { %899 = vmatpush3.bf16.msra.mxu1 %v1027_v12  ;;  %v677_v12 = vld [vmem:[%s980_s15 + $0x38] sm:$0xff] }
 0x4b3   : > { %900 = vmatprep.subr.bf16.mxu1 %v952_v10 }
 0x4b6   : > { %901 = vmatpush3.bf16.msra.mxu1 %v1033_v13 }
 0x4b7   : > { %902 = vmatprep.subr.bf16.mxu1 %v952_v10 }
 0x4ba   : > { %903 = vmatpush3.bf16.msra.mxu1 %v1039_v14 }
 0x4bb   : > { %904 = vmatprep.subr.bf16.mxu1 %v952_v10 }
 0x4be   : > { %905 = vmatpush3.bf16.msra.mxu1 %v1045_v15 }
 0x4bf   : > { %906 = vmatprep.subr.bf16.mxu1 %v952_v10 }
 0x4c2   : > { %907 = vmatpush3.bf16.msra.mxu1 %v1051_v16 }
 0x4c3   : > { %908 = vmatprep.subr.bf16.mxu1 %v952_v10 }
 0x4c6   : > { %909 = vmatpush3.bf16.msra.mxu1 %v1057_v18 }
 0x57c   : > { %v474_v61 = vpop.f32.mrb[8].mxu1 }
 0x57d   : > { %v482_v62 = vadd.f32 %v673_v60, %v474_v61  ;;  %v872_v63 = vpop.f32.mrb[9].mxu1 }
 0x57e   : > { %v477_v0 = vpop.f32.mrb[10].mxu1 }
 0x57f   : > { %935 = vtanh.f32 %v482_v62  ;;  %v873_v1 = vpop.f32.mrb[11].mxu1 }
 0x589   : > { %v936_v2 = vpop.eup %935 }
 0x58a   : > { %674 = vst [vmem:[%s985_s18 + $0x28] sm:$0xff] %v936_v2  ;;  %v488_v3 = vpack.c.bf16 %v936_v2, %v936_v2 }
 0x58c   : > { %891 = vmatmul.mubr.bf16.vlgmr.msra.gmra.mrb[12].mxu0 %v488_v3 }
 0x65f   : > { %v523_v5 = vpop.f32.mrb[12].mxu0 }
 0x660   : > { %v531_v6 = vadd.f32 %v675_v4, %v523_v5  ;;  %v892_v7 = vpop.f32.mrb[13].mxu0 }
 0x661   : > { %v526_v8 = vpop.f32.mrb[14].mxu0 }
 0x662   : > { %937 = vtanh.f32 %v531_v6  ;;  %v893_v9 = vpop.f32.mrb[15].mxu0 }
 0x66c   : > { %v938_v10 = vpop.eup %937 }
 0x66d   : > { %676 = vst [vmem:[%s985_s18 + $0x30] sm:$0xff] %v938_v10  ;;  %v537_v11 = vpack.c.bf16 %v938_v10, %v938_v10 }
 0x66f   : > { %911 = vmatmul.mubr.bf16.vlgmr.msra.gmra.mrb[12].mxu1 %v537_v11 }
 0x742   : > { %v572_v13 = vpop.f32.mrb[12].mxu1 }
 0x743   : > { %v580_v14 = vadd.f32 %v677_v12, %v572_v13  ;;  %v912_v15 = vpop.f32.mrb[13].mxu1 }
 0x744   : > { %v575_v16 = vpop.f32.mrb[14].mxu1 }
 0x745   : > { %939 = vtanh.f32 %v580_v14  ;;  %v913_v17 = vpop.f32.mrb[15].mxu1 }
 0x74f   : > { %v940_v18 = vpop.eup %939 }
 0x750   : > { %582 = vst [vmem:[#allocation3] sm:$0xff] %v940_v18  ;;  %678 = vst [vmem:[%s985_s18 + $0x38] sm:$0xff] %v940_v18 }
 0x751 PF: > { %s12_s9 = sadd.s32 1, %s949_s9  }
 0x752   : > { %p9_p5 = scmp.ge.s32.totalorder %s12_s9, 4  }
 0x754   :  { %11 = sbr.rel (!%p9_p5) target bundleno = 1 (0x1), region = 114 }
 0x75b   :  { %607 = vsyncmov [#allocation4] }
 0x75e   :  { %s608_s7 = vpop.sfrf %607 }
 0x75f   :  { %p681_p6 = scmp.ne.s32.totalorder %s608_s7, 0 }
 0x761   :  { %612 = shalt.err (%p681_p6)  }

</bundles_post_ra>
